<compile_context>
chip_gen: v5e
topology: v5e:2x2
jax: 0.10.0
libtpu: 0.0.40
codegen_flags: <defaults>
</compile_context>

<pallas_src>
import math
import numpy as np
import jax
import jax.numpy as jnp
from jax.experimental import pallas as pl
from jax.experimental.pallas import tpu as pltpu


# ----------------------------------------------------------------------------
# Deterministic parameter construction (mirrors ButterflyFFT.__init__)
# ----------------------------------------------------------------------------
def factors(n):
    return [(i, n // i) for i in range(1, math.floor(math.sqrt(n)) + 1) if n % i == 0]


def make_butterfly_fft_params(n, direction="fft", norm="ortho"):
    """DFT matrix -> permutation + rank-1 monarch factors (numpy, complex128)."""
    f = factors(n)[-1]
    sizes = (f[1], f[0])  # sizes[0] >= sizes[1], sizes[0]*sizes[1] == n
    idx = np.arange(n)
    sign = -1.0 if direction == "fft" else 1.0
    dft = np.exp(sign * 2j * np.pi * np.outer(idx, idx) / n).astype(np.complex128)
    if norm == "ortho":
        dft = dft / np.sqrt(n)
    elif direction == "ifft":
        dft = dft / n
    dft = dft.T
    # perm = rearrange(arange(n), '(i j) -> (j i)', j=sizes[0])
    perm = np.arange(n).reshape(sizes[1], sizes[0]).T.reshape(-1)
    M = dft[:, perm]
    k, r = sizes[1], sizes[0]
    p, s = n // k, n // r
    # rearrange '(p k) (r s) -> k r p s'
    Mb = M.reshape(p, k, r, s).transpose(1, 2, 0, 3)
    U, S, Vt = np.linalg.svd(Mb)
    Ssqrt = np.sqrt(S[..., :1])                          # (k, r, 1)
    Uc = U[..., :, :1] * Ssqrt[..., None, :]             # (k, r, p, 1)
    Vtc = Ssqrt[..., :, None] * Vt[..., :1, :]           # (k, r, 1, s)
    w1 = Vtc[:, :, 0, :].transpose(1, 0, 2)              # (sizes[0], sizes[1], sizes[1])
    w2 = Uc[:, :, :, 0].transpose(0, 2, 1)               # (sizes[1], sizes[0], sizes[0])
    return perm, w1, w2


# ----------------------------------------------------------------------------
# Device-dependent tiling budget / core count
# ----------------------------------------------------------------------------
_MIB = 1024 * 1024
_TB_CAP = 256                       # batch-tile cap (rows per grid step)
_VMEM_BUDGET = 44 * _MIB            # conservative: fits v7x's 64 MiB physical VMEM
_VMEM_LIMIT = 48 * _MIB             # scoped-vmem limit handed to Mosaic
_NUM_CORES = 1                      # TensorCores per chip (v7x has 2)

try:
    _info = pltpu.get_tpu_info()
    if int(getattr(_info, "vmem_capacity_bytes", 0) or 0) >= 100 * _MIB:
        _TB_CAP = 512
        _VMEM_BUDGET = 100 * _MIB
        _VMEM_LIMIT = 110 * _MIB
    for _attr in ("num_cores", "num_tensorcores", "tensorcore_count", "core_count"):
        _v = getattr(_info, _attr, None)
        if _v:
            _NUM_CORES = int(_v)
            break
except Exception:
    pass
if _NUM_CORES <= 1:
    try:
        _dev = jax.devices()[0]
        for _attr in ("num_cores", "core_count"):
            _v = getattr(_dev, _attr, None)
            if _v:
                _NUM_CORES = int(_v)
                break
    except Exception:
        pass


def _round_up(x, m):
    return -(-x // m) * m


def _vmem_resident(tb, N):
    io = 4 * 2 * tb * N * 4            # xr/xi/or/oi blocks, double buffered
    w = 3 * 2 * N * N * 4              # 3 weight planes (worst case double buffered)
    tmp = 8 * tb * N * 4               # live matmul intermediates
    return io + w + tmp


def _vmem_tiled(tb, tn, tk):
    io = 2 * 2 * tb * tk * 4 + 2 * 2 * tb * tn * 4
    w = 3 * 2 * tk * tn * 4
    acc = 2 * tb * tn * 4
    tmp = 6 * tb * tn * 4
    return io + w + acc + tmp


def _vmem_fused(tb2, n1p, n2p):
    w = 3 * 2 * (n1p * n1p + n2p * n2p) * 4     # both weight sets resident
    io = 4 * 2 * tb2 * n1p * n2p * 4            # x/out planes, double buffered
    tmp = 10 * tb2 * n1p * n2p * 4              # unrolled matmul intermediates
    return w + io + tmp


def _choose_tb_resident(bgroup, N):
    tb = _TB_CAP
    while tb > 8 and _vmem_resident(tb, N) > _VMEM_BUDGET:
        tb //= 2
    tb = max(tb, 8)
    if bgroup <= tb:
        if _NUM_CORES >= 2 and bgroup >= 16:
            # give every TensorCore at least one grid step (v7x megacore only)
            tb = _round_up(-(-bgroup // _NUM_CORES), 8)
            return tb, _NUM_CORES * tb
        tb = _round_up(bgroup, 8)
        return tb, tb
    return tb, _round_up(bgroup, tb)


def _choose_tiles_tiled(bgroup, N):
    tn = 256 if N % 256 == 0 else 128
    tk = tn
    tb = _TB_CAP
    while tb > 8 and _vmem_tiled(tb, tn, tk) > _VMEM_BUDGET:
        tb //= 2
    tb = max(tb, 8)
    if bgroup <= tb:
        tb = _round_up(bgroup, 8)
        return tb, tb, tn, tk
    return tb, _round_up(bgroup, tb), tn, tk


# ----------------------------------------------------------------------------
# Kernels
# ----------------------------------------------------------------------------
def _fft1d_kernel(xr_ref, xi_ref, wr_ref, wi_ref, ws_ref, or_ref, oi_ref):
    """Single collapsed complex matmul (3-mult Karatsuba), all on the MXU."""
    ar = xr_ref[...]
    ai = xi_ref[...]
    t1 = jnp.dot(ar, wr_ref[...], preferred_element_type=jnp.float32)
    t2 = jnp.dot(ai, wi_ref[...], preferred_element_type=jnp.float32)
    t3 = jnp.dot(ar + ai, ws_ref[...], preferred_element_type=jnp.float32)
    or_ref[...] = t1 - t2
    oi_ref[...] = t3 - t1 - t2


def _fft1d_resident(xr, xi, wr, wi, ws, tb):
    bpad, N = xr.shape
    grid = (bpad // tb,)
    x_spec = pl.BlockSpec((tb, N), lambda i: (i, 0))
    w_spec = pl.BlockSpec((N, N), lambda i: (0, 0))   # constant: DMA'd once by the pipeline
    out_shape = (jax.ShapeDtypeStruct((bpad, N), jnp.float32),
                 jax.ShapeDtypeStruct((bpad, N), jnp.float32))
    return pl.pallas_call(
        _fft1d_kernel,
        out_shape=out_shape,
        grid_spec=pltpu.PrefetchScalarGridSpec(
            num_scalar_prefetch=0, grid=grid,
            in_specs=[x_spec, x_spec, w_spec, w_spec, w_spec],
            out_specs=(x_spec, x_spec)),
        compiler_params=pltpu.CompilerParams(
            dimension_semantics=("parallel",),
            vmem_limit_bytes=_VMEM_LIMIT),
    )(xr, xi, wr, wi, ws)


def _fft1d_kernel_tiled(xr_ref, xi_ref, wr_ref, wi_ref, ws_ref,
                        or_ref, oi_ref, accr, acci):
    """Large-N fallback: standard tiled matmul with f32 accumulator scratch."""
    @pl.when(pl.program_id(2) == 0)
    def _():
        accr[...] = jnp.zeros_like(accr)
        acci[...] = jnp.zeros_like(acci)

    ar = xr_ref[...]
    ai = xi_ref[...]
    t1 = jnp.dot(ar, wr_ref[...], preferred_element_type=jnp.float32)
    t2 = jnp.dot(ai, wi_ref[...], preferred_element_type=jnp.float32)
    t3 = jnp.dot(ar + ai, ws_ref[...], preferred_element_type=jnp.float32)
    accr[...] += t1 - t2
    acci[...] += t3 - t1 - t2

    @pl.when(pl.program_id(2) == pl.num_programs(2) - 1)
    def _():
        or_ref[...] = accr[...]
        oi_ref[...] = acci[...]


def _fft1d_tiled(xr, xi, wr, wi, ws, tb, tn, tk):
    bpad, N = xr.shape
    grid = (bpad // tb, N // tn, N // tk)
    x_spec = pl.BlockSpec((tb, tk), lambda i, j, k: (i, k))
    w_spec = pl.BlockSpec((tk, tn), lambda i, j, k: (k, j))
    o_spec = pl.BlockSpec((tb, tn), lambda i, j, k: (i, j))
    out_shape = (jax.ShapeDtypeStruct((bpad, N), jnp.float32),
                 jax.ShapeDtypeStruct((bpad, N), jnp.float32))
    return pl.pallas_call(
        _fft1d_kernel_tiled,
        out_shape=out_shape,
        grid_spec=pltpu.PrefetchScalarGridSpec(
            num_scalar_prefetch=0, grid=grid,
            in_specs=[x_spec, x_spec, w_spec, w_spec, w_spec],
            out_specs=(o_spec, o_spec),
            scratch_shapes=[pltpu.VMEM((tb, tn), jnp.float32),
                            pltpu.VMEM((tb, tn), jnp.float32)]),
        compiler_params=pltpu.CompilerParams(
            dimension_semantics=("parallel", "parallel", "arbitrary"),
            vmem_limit_bytes=_VMEM_LIMIT),
    )(xr, xi, wr, wi, ws)


def _fft2d_fused_kernel(xr_ref, xi_ref,
                        w1tr_ref, w1ti_ref, w1ts_ref,
                        w2r_ref, w2i_ref, w2s_ref,
                        or_ref, oi_ref):
    """Fused 2-D FFT: out[b] = W1tot^T @ x[b] @ W2tot (no HBM transpose)."""
    w1tr = w1tr_ref[...]
    w1ti = w1ti_ref[...]
    w1ts = w1ts_ref[...]
    w2r = w2r_ref[...]
    w2i = w2i_ref[...]
    w2s = w2s_ref[...]
    for t in range(xr_ref.shape[0]):      # static unroll over the batch tile
        ar = xr_ref[t]
        ai = xi_ref[t]
        # FFT along n1 (left multiply), 3-mult Karatsuba
        t1 = jnp.dot(w1tr, ar, preferred_element_type=jnp.float32)
        t2 = jnp.dot(w1ti, ai, preferred_element_type=jnp.float32)
        t3 = jnp.dot(w1ts, ar + ai, preferred_element_type=jnp.float32)
        yr = t1 - t2
        yi = t3 - t1 - t2
        # FFT along n2 (right multiply)
        u1 = jnp.dot(yr, w2r, preferred_element_type=jnp.float32)
        u2 = jnp.dot(yi, w2i, preferred_element_type=jnp.float32)
        u3 = jnp.dot(yr + yi, w2s, preferred_element_type=jnp.float32)
        or_ref[t] = u1 - u2
        oi_ref[t] = u3 - u1 - u2


def _fft2d_fused(xr, xi, w1tr, w1ti, w1ts, w2r, w2i, w2s, tb2):
    bpad, n1p, n2p = xr.shape
    grid = (bpad // tb2,)
    x_spec = pl.BlockSpec((tb2, n1p, n2p), lambda b: (b, 0, 0))
    w1_spec = pl.BlockSpec((n1p, n1p), lambda b: (0, 0))
    w2_spec = pl.BlockSpec((n2p, n2p), lambda b: (0, 0))
    out_shape = (jax.ShapeDtypeStruct((bpad, n1p, n2p), jnp.float32),
                 jax.ShapeDtypeStruct((bpad, n1p, n2p), jnp.float32))
    return pl.pallas_call(
        _fft2d_fused_kernel,
        out_shape=out_shape,
        grid_spec=pltpu.PrefetchScalarGridSpec(
            num_scalar_prefetch=0, grid=grid,
            in_specs=[x_spec, x_spec,
                      w1_spec, w1_spec, w1_spec,
                      w2_spec, w2_spec, w2_spec],
            out_specs=(x_spec, x_spec)),
        compiler_params=pltpu.CompilerParams(
            dimension_semantics=("parallel",),
            vmem_limit_bytes=_VMEM_LIMIT),
    )(xr, xi, w1tr, w1ti, w1ts, w2r, w2i, w2s)


# ----------------------------------------------------------------------------
# Module wrappers
# ----------------------------------------------------------------------------
class ButterflyFFTJax:
    def __init__(self, n, direction="fft", norm="ortho", force_tiled=False):
        perm, w1, w2 = make_butterfly_fft_params(n, direction, norm)
        self.n = n
        self.force_tiled = force_tiled
        self.perm = perm
        self.w1 = w1.astype(np.complex64)          # kept for reference checks
        self.w2 = w2.astype(np.complex64)
        K, Q, P = w1.shape
        L, S, R = w2.shape
        assert Q == L and K == R and S * L == n and K * P == n

        # Dense stage 1: W1d[k*P + p, k*Q + q] = w1[k, q, p]; bake perm into rows.
        W1d = np.zeros((n, n), dtype=np.complex128)
        kk, qq, pp = np.meshgrid(np.arange(K), np.arange(Q), np.arange(P), indexing="ij")
        W1d[kk * P + pp, kk * Q + qq] = w1[kk, qq, pp]
        W1p = np.zeros_like(W1d)
        W1p[perm, :] = W1d                          # out1 = x @ W1p == x[:, perm] @ W1d

        # Dense stage 2: W2d[r*L + l, s*L + l] = w2[l, s, r]  (monarch scatter)
        W2d = np.zeros((n, n), dtype=np.complex128)
        ll, ss, rr = np.meshgrid(np.arange(L), np.arange(S), np.arange(R), indexing="ij")
        W2d[rr * L + ll, ss * L + ll] = w2[ll, ss, rr]

        # Collapse both (dense) stages into one matrix: (x@W1p)@W2d == x@(W1p@W2d).
        Wtot = W1p @ W2d                            # complex128, exact

        # Lane-dense padding / grouping
        if n >= 128:
            n_pad = _round_up(n, 128)
            g = 1
        else:
            n_pad = 1 << (n - 1).bit_length()       # next power of 2 (divides 128)
            g = 128 // n_pad
        self.n_pad, self.g = n_pad, g
        self.N = g * n_pad

        Wpad = np.zeros((n_pad, n_pad), dtype=np.complex128)
        Wpad[:n, :n] = Wtot
        self.w_pad = Wpad                           # used by the fused 2-D path

        Wfull = np.kron(np.eye(g), Wpad) if g > 1 else Wpad
        self.wr = jnp.asarray(Wfull.real, jnp.float32)
        self.wi = jnp.asarray(Wfull.imag, jnp.float32)
        self.ws = jnp.asarray(Wfull.real + Wfull.imag, jnp.float32)  # Karatsuba sum plane

    def apply_planar(self, xr, xi):
        """FFT along the last axis; real/imag planes in -> real/imag planes out."""
        shape = xr.shape
        n = self.n
        assert shape[-1] == n
        bflat = 1
        for d in shape[:-1]:
            bflat *= int(d)
        n_pad, g, N = self.n_pad, self.g, self.N

        xr2 = xr.reshape(bflat, n)
        xi2 = xi.reshape(bflat, n)
        if n_pad != n:
            cpad = ((0, 0), (0, n_pad - n))
            xr2 = jnp.pad(xr2, cpad)
            xi2 = jnp.pad(xi2, cpad)

        bgroup = -(-bflat // g)
        use_tiled = self.force_tiled or _vmem_resident(64, N) > _VMEM_BUDGET
        if use_tiled:
            tb, bgroup_pad, tn, tk = _choose_tiles_tiled(bgroup, N)
        else:
            tb, bgroup_pad = _choose_tb_resident(bgroup, N)

        brows_pad = bgroup_pad * g
        if brows_pad != bflat:
            rpad = ((0, brows_pad - bflat), (0, 0))
            xr2 = jnp.pad(xr2, rpad)
            xi2 = jnp.pad(xi2, rpad)
        xr2 = xr2.reshape(bgroup_pad, N)
        xi2 = xi2.reshape(bgroup_pad, N)

        if use_tiled:
            outr, outi = _fft1d_tiled(xr2, xi2, self.wr, self.wi, self.ws, tb, tn, tk)
        else:
            outr, outi = _fft1d_resident(xr2, xi2, self.wr, self.wi, self.ws, tb)

        outr = outr.reshape(brows_pad, n_pad)[:bflat, :n].reshape(shape)
        outi = outi.reshape(brows_pad, n_pad)[:bflat, :n].reshape(shape)
        return outr, outi

    def __call__(self, x):
        xr = jnp.real(x).astype(jnp.float32)
        xi = jnp.imag(x).astype(jnp.float32)
        outr, outi = self.apply_planar(xr, xi)
        return (outr + 1j * outi).astype(jnp.complex64)


class ButterflyFFT2Jax:
    def __init__(self, n1, n2, direction="fft", norm="ortho"):
        self.fft1 = ButterflyFFTJax(n1, direction=direction, norm=norm)
        self.fft2 = ButterflyFFTJax(n2, direction=direction, norm=norm)
        self.n1, self.n2 = n1, n2
        n1p, n2p = self.fft1.n_pad, self.fft2.n_pad
        self.n1p, self.n2p = n1p, n2p
        # Fused 2-D path: out[b] = W1tot^T @ x[b] @ W2tot, removing the HBM
        # swapaxes round-trips between the two 1-D FFTs.  Used when both padded
        # axes are lane-dense (>= 128) and all weight planes fit the VMEM budget.
        self._fused = (self.fft1.g == 1 and self.fft2.g == 1
                       and _vmem_fused(1, n1p, n2p) <= _VMEM_BUDGET)
        if self._fused:
            W1t = self.fft1.w_pad.T                 # (n1p, n1p) complex128
            W2 = self.fft2.w_pad                    # (n2p, n2p) complex128
            self.w1tr = jnp.asarray(W1t.real, jnp.float32)
            self.w1ti = jnp.asarray(W1t.imag, jnp.float32)
            self.w1ts = jnp.asarray(W1t.real + W1t.imag, jnp.float32)
            self.w2r = jnp.asarray(W2.real, jnp.float32)
            self.w2i = jnp.asarray(W2.imag, jnp.float32)
            self.w2s = jnp.asarray(W2.real + W2.imag, jnp.float32)

    def _fused_forward(self, xr, xi):
        shape = xr.shape
        n1, n2 = self.n1, self.n2
        assert shape[-2] == n1 and shape[-1] == n2
        n1p, n2p = self.n1p, self.n2p
        B = 1
        for d in shape[:-2]:
            B *= int(d)
        xr3 = xr.reshape(B, n1, n2)
        xi3 = xi.reshape(B, n1, n2)
        if (n1p, n2p) != (n1, n2):
            pad = ((0, 0), (0, n1p - n1), (0, n2p - n2))
            xr3 = jnp.pad(xr3, pad)
            xi3 = jnp.pad(xi3, pad)

        tb2 = 8
        while tb2 > 1 and _vmem_fused(tb2, n1p, n2p) > _VMEM_BUDGET:
            tb2 //= 2
        if _NUM_CORES >= 2 and B >= 2:
            tb2 = min(tb2, max(1, -(-B // _NUM_CORES)))   # keep >=2 steps for megacore
        tb2 = max(1, min(tb2, B))
        Bpad = _round_up(B, tb2)
        if Bpad != B:
            pad = ((0, Bpad - B), (0, 0), (0, 0))
            xr3 = jnp.pad(xr3, pad)
            xi3 = jnp.pad(xi3, pad)

        outr, outi = _fft2d_fused(xr3, xi3,
                                  self.w1tr, self.w1ti, self.w1ts,
                                  self.w2r, self.w2i, self.w2s, tb2)
        outr = outr[:B, :n1, :n2].reshape(shape)
        outi = outi[:B, :n1, :n2].reshape(shape)
        return outr, outi

    def __call__(self, x):
        # x: complex, shape (..., n1, n2). Real/imag stay planar throughout.
        xr = jnp.real(x).astype(jnp.float32)
        xi = jnp.imag(x).astype(jnp.float32)
        if self._fused:
            outr, outi = self._fused_forward(xr, xi)
        else:
            # Small-n fallback: two lane-grouped 1-D FFTs (transpose via XLA).
            yr, yi = self.fft1.apply_planar(jnp.swapaxes(xr, -1, -2),
                                            jnp.swapaxes(xi, -1, -2))
            yr = jnp.swapaxes(yr, -1, -2)
            yi = jnp.swapaxes(yi, -1, -2)
            outr, outi = self.fft2.apply_planar(yr, yi)
            # TODO(synk): a packed small-n fused kernel could also avoid these
            # XLA transposes; small-n traffic is tiny so it is left as-is.
        return (outr + 1j * outi).astype(jnp.complex64)


# ----------------------------------------------------------------------------
# Pure numpy reference of the PyTorch forward semantics (for verification)
# ----------------------------------------------------------------------------
def _ref_blockdiag_butterfly_multiply(x, w1, w2):
    B, n = x.shape
    k, q, p = w1.shape
    l, s, r = w2.shape
    out1 = np.einsum("bkp,kqp->bkq", x.reshape(B, k, p), w1)
    out1 = out1.reshape(B, r, l).transpose(0, 2, 1)
    out2 = np.einsum("blr,lsr->bls", out1, w2)
    return out2.transpose(0, 2, 1).reshape(B, s * l)


def _ref_butterfly_fft(x, perm, w1, w2):
    shape = x.shape
    xp = x[..., perm].reshape(-1, shape[-1])
    return _ref_blockdiag_butterfly_multiply(xp, w1, w2).reshape(shape)


def _ref_butterfly_fft2(x, m):
    xt = np.swapaxes(x, -1, -2)
    y = _ref_butterfly_fft(xt, m.fft1.perm, m.fft1.w1, m.fft1.w2)
    y = np.swapaxes(y, -1, -2)
    return _ref_butterfly_fft(y, m.fft2.perm, m.fft2.w1, m.fft2.w2)


if __name__ == "__main__":
    key = jax.random.PRNGKey(0)

    def make_complex(shape, salt):
        kr, ki = jax.random.split(jax.random.fold_in(key, salt))
        xr = jax.random.normal(kr, shape, dtype=jnp.float32)
        xi = jax.random.normal(ki, shape, dtype=jnp.float32)
        return (xr + 1j * xi).astype(jnp.complex64)

    def run_case_2d(B, n1, n2):
        x = make_complex((B, n1, n2), 1000 * n1 + n2)
        model = ButterflyFFT2Jax(n1, n2, direction="fft", norm="ortho")
        fwd = jax.jit(lambda v: model(v))
        out = jax.block_until_ready(fwd(x))

        x_np = np.asarray(x).astype(np.complex64)
        ref = _ref_butterfly_fft2(x_np, model).astype(np.complex64)
        np.testing.assert_allclose(np.asarray(out), ref, atol=5e-4, rtol=5e-4)

        # Rank-1 monarch projection of the DFT is exact, so this equals fft2.
        fft_ref = np.fft.fft2(x_np, norm="ortho")
        np.testing.assert_allclose(np.asarray(out), fft_ref, atol=2e-3, rtol=2e-3)

    def run_case_1d_tiled(B, n):
        # Exercises the large-N tiled-matmul fallback (forced for test speed).
        x = make_complex((B, n), 7 * n + B)
        model = ButterflyFFTJax(n, direction="fft", norm="ortho", force_tiled=True)
        fwd = jax.jit(lambda v: model(v))
        out = jax.block_until_ready(fwd(x))
        fft_ref = np.fft.fft(np.asarray(x).astype(np.complex64), norm="ortho")
        np.testing.assert_allclose(np.asarray(out), fft_ref, atol=2e-3, rtol=2e-3)

    run_case_2d(2, 16, 8)        # small n: lane-grouped resident path (g=8 / g=16)
    run_case_2d(3, 32, 20)       # awkward n=20: zero-padded to 32, grouped to 128 lanes
    run_case_2d(2, 128, 256)     # fused 2-D kernel (no HBM transpose round-trip)
    run_case_1d_tiled(20, 384)   # N-tiled accumulator matmul path (large-N / v7x fallback)
    print("KERNEL_OK")
</pallas_src>

<mosaic_0001>
module attributes {stable_mosaic.version = 11 : i64} {
  func.func @_fft1d_kernel(%arg0: i32, %arg1: memref<8x128xf32, #tpu.memory_space<vmem>>, %arg2: memref<8x128xf32, #tpu.memory_space<vmem>>, %arg3: memref<128x128xf32, #tpu.memory_space<vmem>>, %arg4: memref<128x128xf32, #tpu.memory_space<vmem>>, %arg5: memref<128x128xf32, #tpu.memory_space<vmem>>, %arg6: memref<8x128xf32, #tpu.memory_space<vmem>>, %arg7: memref<8x128xf32, #tpu.memory_space<vmem>>) attributes {dimension_semantics = [#tpu.dimension_semantics<parallel>], iteration_bounds = array<i64: 1>, scalar_prefetch = 0 : i64, scratch_operands = 0 : i64, tpu.core_type = #tpu.core_type<tc>, window_params = [{transform_indices = @transform_0, window_bounds = array<i64: 8, 128>}, {transform_indices = @transform_1, window_bounds = array<i64: 8, 128>}, {pipeline_mode = #tpu.pipeline_mode<synchronous>, transform_indices = @transform_2, window_bounds = array<i64: 128, 128>}, {pipeline_mode = #tpu.pipeline_mode<synchronous>, transform_indices = @transform_3, window_bounds = array<i64: 128, 128>}, {pipeline_mode = #tpu.pipeline_mode<synchronous>, transform_indices = @transform_4, window_bounds = array<i64: 128, 128>}, {transform_indices = @transform_5, window_bounds = array<i64: 8, 128>}, {transform_indices = @transform_6, window_bounds = array<i64: 8, 128>}]} {
    %c0 = arith.constant 0 : index
    %c0_0 = arith.constant 0 : index
    %0 = vector.load %arg1[%c0, %c0_0] : memref<8x128xf32, #tpu.memory_space<vmem>>, vector<8x128xf32>
    %c0_1 = arith.constant 0 : index
    %c0_2 = arith.constant 0 : index
    %1 = vector.load %arg2[%c0_1, %c0_2] : memref<8x128xf32, #tpu.memory_space<vmem>>, vector<8x128xf32>
    %c0_3 = arith.constant 0 : index
    %c0_4 = arith.constant 0 : index
    %2 = vector.load %arg3[%c0_3, %c0_4] : memref<128x128xf32, #tpu.memory_space<vmem>>, vector<128x128xf32>
    %cst = arith.constant dense<0.000000e+00> : vector<8x128xf32>
    %3 = tpu.matmul %0, %2, %cst {dimension_numbers = #tpu.dot_dimension_numbers<[1], [0], [0], [1], [0, 0, 1, 1], [], []>} : vector<8x128xf32>, vector<128x128xf32>, vector<8x128xf32> -> vector<8x128xf32>
    %c0_5 = arith.constant 0 : index
    %c0_6 = arith.constant 0 : index
    %4 = vector.load %arg4[%c0_5, %c0_6] : memref<128x128xf32, #tpu.memory_space<vmem>>, vector<128x128xf32>
    %cst_7 = arith.constant dense<0.000000e+00> : vector<8x128xf32>
    %5 = tpu.matmul %1, %4, %cst_7 {dimension_numbers = #tpu.dot_dimension_numbers<[1], [0], [0], [1], [0, 0, 1, 1], [], []>} : vector<8x128xf32>, vector<128x128xf32>, vector<8x128xf32> -> vector<8x128xf32>
    %6 = arith.addf %0, %1 : vector<8x128xf32>
    %c0_8 = arith.constant 0 : index
    %c0_9 = arith.constant 0 : index
    %7 = vector.load %arg5[%c0_8, %c0_9] : memref<128x128xf32, #tpu.memory_space<vmem>>, vector<128x128xf32>
    %cst_10 = arith.constant dense<0.000000e+00> : vector<8x128xf32>
    %8 = tpu.matmul %6, %7, %cst_10 {dimension_numbers = #tpu.dot_dimension_numbers<[1], [0], [0], [1], [0, 0, 1, 1], [], []>} : vector<8x128xf32>, vector<128x128xf32>, vector<8x128xf32> -> vector<8x128xf32>
    %9 = arith.subf %3, %5 : vector<8x128xf32>
    %c0_11 = arith.constant 0 : index
    %c0_12 = arith.constant 0 : index
    %10 = vector.load %arg6[%c0_11, %c0_12] : memref<8x128xf32, #tpu.memory_space<vmem>>, vector<8x128xf32>
    tpu.vector_store %arg6[%c0_11, %c0_12], %9 {strides = array<i32>} : memref<8x128xf32, #tpu.memory_space<vmem>>, vector<8x128xf32>,
    %11 = arith.subf %8, %3 : vector<8x128xf32>
    %12 = arith.subf %11, %5 : vector<8x128xf32>
    %c0_13 = arith.constant 0 : index
    %c0_14 = arith.constant 0 : index
    %13 = vector.load %arg7[%c0_13, %c0_14] : memref<8x128xf32, #tpu.memory_space<vmem>>, vector<8x128xf32>
    tpu.vector_store %arg7[%c0_13, %c0_14], %12 {strides = array<i32>} : memref<8x128xf32, #tpu.memory_space<vmem>>, vector<8x128xf32>,
    return
  }
  func.func @transform_0(%arg0: i32) -> (i32, i32) {
    %c0_i32 = arith.constant 0 : i32
    %c0_i32_0 = arith.constant 0 : i32
    return %arg0, %c0_i32 : i32, i32
  }
  func.func @transform_1(%arg0: i32) -> (i32, i32) {
    %c0_i32 = arith.constant 0 : i32
    %c0_i32_0 = arith.constant 0 : i32
    return %arg0, %c0_i32 : i32, i32
  }
  func.func @transform_2(%arg0: i32) -> (i32, i32) {
    %c0_i32 = arith.constant 0 : i32
    %c0_i32_0 = arith.constant 0 : i32
    %c0_i32_1 = arith.constant 0 : i32
    return %c0_i32, %c0_i32_0 : i32, i32
  }
  func.func @transform_3(%arg0: i32) -> (i32, i32) {
    %c0_i32 = arith.constant 0 : i32
    %c0_i32_0 = arith.constant 0 : i32
    %c0_i32_1 = arith.constant 0 : i32
    return %c0_i32, %c0_i32_0 : i32, i32
  }
  func.func @transform_4(%arg0: i32) -> (i32, i32) {
    %c0_i32 = arith.constant 0 : i32
    %c0_i32_0 = arith.constant 0 : i32
    %c0_i32_1 = arith.constant 0 : i32
    return %c0_i32, %c0_i32_0 : i32, i32
  }
  func.func @transform_5(%arg0: i32) -> (i32, i32) {
    %c0_i32 = arith.constant 0 : i32
    %c0_i32_0 = arith.constant 0 : i32
    return %arg0, %c0_i32 : i32, i32
  }
  func.func @transform_6(%arg0: i32) -> (i32, i32) {
    %c0_i32 = arith.constant 0 : i32
    %c0_i32_0 = arith.constant 0 : i32
    return %arg0, %c0_i32 : i32, i32
  }
}

module attributes {stable_mosaic.version = 11 : i64} {
  func.func @_fft1d_kernel(%arg0: i32, %arg1: memref<8x128xf32, #tpu.memory_space<vmem>>, %arg2: memref<8x128xf32, #tpu.memory_space<vmem>>, %arg3: memref<128x128xf32, #tpu.memory_space<vmem>>, %arg4: memref<128x128xf32, #tpu.memory_space<vmem>>, %arg5: memref<128x128xf32, #tpu.memory_space<vmem>>, %arg6: memref<8x128xf32, #tpu.memory_space<vmem>>, %arg7: memref<8x128xf32, #tpu.memory_space<vmem>>) attributes {dimension_semantics = [#tpu.dimension_semantics<parallel>], iteration_bounds = array<i64: 1>, scalar_prefetch = 0 : i64, scratch_operands = 0 : i64, tpu.core_type = #tpu.core_type<tc>, window_params = [{transform_indices = @transform_0, window_bounds = array<i64: 8, 128>}, {transform_indices = @transform_1, window_bounds = array<i64: 8, 128>}, {pipeline_mode = #tpu.pipeline_mode<synchronous>, transform_indices = @transform_2, window_bounds = array<i64: 128, 128>}, {pipeline_mode = #tpu.pipeline_mode<synchronous>, transform_indices = @transform_3, window_bounds = array<i64: 128, 128>}, {pipeline_mode = #tpu.pipeline_mode<synchronous>, transform_indices = @transform_4, window_bounds = array<i64: 128, 128>}, {transform_indices = @transform_5, window_bounds = array<i64: 8, 128>}, {transform_indices = @transform_6, window_bounds = array<i64: 8, 128>}]} {
    %c0 = arith.constant 0 : index
    %c0_0 = arith.constant 0 : index
    %0 = vector.load %arg1[%c0, %c0_0] : memref<8x128xf32, #tpu.memory_space<vmem>>, vector<8x128xf32>
    %c0_1 = arith.constant 0 : index
    %c0_2 = arith.constant 0 : index
    %1 = vector.load %arg2[%c0_1, %c0_2] : memref<8x128xf32, #tpu.memory_space<vmem>>, vector<8x128xf32>
    %c0_3 = arith.constant 0 : index
    %c0_4 = arith.constant 0 : index
    %2 = vector.load %arg3[%c0_3, %c0_4] : memref<128x128xf32, #tpu.memory_space<vmem>>, vector<128x128xf32>
    %cst = arith.constant dense<0.000000e+00> : vector<8x128xf32>
    %3 = tpu.matmul %0, %2, %cst {dimension_numbers = #tpu.dot_dimension_numbers<[1], [0], [0], [1], [0, 0, 1, 1], [], []>} : vector<8x128xf32>, vector<128x128xf32>, vector<8x128xf32> -> vector<8x128xf32>
    %c0_5 = arith.constant 0 : index
    %c0_6 = arith.constant 0 : index
    %4 = vector.load %arg4[%c0_5, %c0_6] : memref<128x128xf32, #tpu.memory_space<vmem>>, vector<128x128xf32>
    %cst_7 = arith.constant dense<0.000000e+00> : vector<8x128xf32>
    %5 = tpu.matmul %1, %4, %cst_7 {dimension_numbers = #tpu.dot_dimension_numbers<[1], [0], [0], [1], [0, 0, 1, 1], [], []>} : vector<8x128xf32>, vector<128x128xf32>, vector<8x128xf32> -> vector<8x128xf32>
    %6 = arith.addf %0, %1 : vector<8x128xf32>
    %c0_8 = arith.constant 0 : index
    %c0_9 = arith.constant 0 : index
    %7 = vector.load %arg5[%c0_8, %c0_9] : memref<128x128xf32, #tpu.memory_space<vmem>>, vector<128x128xf32>
    %cst_10 = arith.constant dense<0.000000e+00> : vector<8x128xf32>
    %8 = tpu.matmul %6, %7, %cst_10 {dimension_numbers = #tpu.dot_dimension_numbers<[1], [0], [0], [1], [0, 0, 1, 1], [], []>} : vector<8x128xf32>, vector<128x128xf32>, vector<8x128xf32> -> vector<8x128xf32>
    %9 = arith.subf %3, %5 : vector<8x128xf32>
    %c0_11 = arith.constant 0 : index
    %c0_12 = arith.constant 0 : index
    %10 = vector.load %arg6[%c0_11, %c0_12] : memref<8x128xf32, #tpu.memory_space<vmem>>, vector<8x128xf32>
    tpu.vector_store %arg6[%c0_11, %c0_12], %9 {strides = array<i32>} : memref<8x128xf32, #tpu.memory_space<vmem>>, vector<8x128xf32>,
    %11 = arith.subf %8, %3 : vector<8x128xf32>
    %12 = arith.subf %11, %5 : vector<8x128xf32>
    %c0_13 = arith.constant 0 : index
    %c0_14 = arith.constant 0 : index
    %13 = vector.load %arg7[%c0_13, %c0_14] : memref<8x128xf32, #tpu.memory_space<vmem>>, vector<8x128xf32>
    tpu.vector_store %arg7[%c0_13, %c0_14], %12 {strides = array<i32>} : memref<8x128xf32, #tpu.memory_space<vmem>>, vector<8x128xf32>,
    return
  }
  func.func @transform_0(%arg0: i32) -> (i32, i32) {
    %c0_i32 = arith.constant 0 : i32
    %c0_i32_0 = arith.constant 0 : i32
    return %arg0, %c0_i32 : i32, i32
  }
  func.func @transform_1(%arg0: i32) -> (i32, i32) {
    %c0_i32 = arith.constant 0 : i32
    %c0_i32_0 = arith.constant 0 : i32
    return %arg0, %c0_i32 : i32, i32
  }
  func.func @transform_2(%arg0: i32) -> (i32, i32) {
    %c0_i32 = arith.constant 0 : i32
    %c0_i32_0 = arith.constant 0 : i32
    %c0_i32_1 = arith.constant 0 : i32
    return %c0_i32, %c0_i32_0 : i32, i32
  }
  func.func @transform_3(%arg0: i32) -> (i32, i32) {
    %c0_i32 = arith.constant 0 : i32
    %c0_i32_0 = arith.constant 0 : i32
    %c0_i32_1 = arith.constant 0 : i32
    return %c0_i32, %c0_i32_0 : i32, i32
  }
  func.func @transform_4(%arg0: i32) -> (i32, i32) {
    %c0_i32 = arith.constant 0 : i32
    %c0_i32_0 = arith.constant 0 : i32
    %c0_i32_1 = arith.constant 0 : i32
    return %c0_i32, %c0_i32_0 : i32, i32
  }
  func.func @transform_5(%arg0: i32) -> (i32, i32) {
    %c0_i32 = arith.constant 0 : i32
    %c0_i32_0 = arith.constant 0 : i32
    return %arg0, %c0_i32 : i32, i32
  }
  func.func @transform_6(%arg0: i32) -> (i32, i32) {
    %c0_i32 = arith.constant 0 : i32
    %c0_i32_0 = arith.constant 0 : i32
    return %arg0, %c0_i32 : i32, i32
  }
}

</mosaic_0001>

<bundles_post_ra>
// kernel: custom-call.1
= control target key start
LH: loop header
LB: loop body
LE: loop exit
PB: predicated region body
PF: predicated region fallthrough
CT: control target
= control target key end

     0   :  { %s56_s0 = inlined_call_operand.hbm [shape: c64[2,16,8], index: 0, kind: input, shape index: {}]   ;;  %s57_s1 = inlined_call_operand.vmem [shape: f32[2,16,8], index: 1, kind: output, shape index: {}]  }
   0x1   :  { %s2_s8 = scalar_lea.hbm %s56_s0, 16 }
   0x2   :  { %3 = vsyncpa [#allocation0], 0  ;;  %s5_s9 = sshll.u32 %s2_s8, 4  ;;  %s7_s12 = sshll.u32 %s57_s1, 4  ;;  %s6_s9 = int_to_ptr.hbm [resolvable:$true] %s5_s9  ;;  %s8_s12 = int_to_ptr.vmem [resolvable:$true] %s7_s12 }
   0x3   :  { %10 = dma.hbm_to_vmem [thread:$0]  %s6_s9, 256, %s8_s12, [#allocation0] }
   0x4   :  { %38 = dma.done.wait [#allocation0], 256  }
   0x5   :  { %39 = vsyncadd [#allocation0], 4294967040 }
   0x6   :  { %13 = vsyncpa [#allocation0], 1 }

// kernel: custom-call
= control target key start
LH: loop header
LB: loop body
LE: loop exit
PB: predicated region body
PF: predicated region fallthrough
CT: control target
= control target key end

     0   :  { %2 = vsyncpa [#allocation0], 0  ;;  %s55_s0 = inlined_call_operand.hbm [shape: c64[2,16,8], index: 0, kind: input, shape index: {}]   ;;  %s56_s1 = inlined_call_operand.vmem [shape: f32[2,16,8], index: 1, kind: output, shape index: {}]  }
   0x1   :  { %s4_s8 = sshll.u32 %s55_s0, 4  ;;  %s6_s11 = sshll.u32 %s56_s1, 4  ;;  %s5_s8 = int_to_ptr.hbm [resolvable:$true] %s4_s8  ;;  %s7_s11 = int_to_ptr.vmem [resolvable:$true] %s6_s11 }
   0x2   :  { %9 = dma.hbm_to_vmem [thread:$0]  %s5_s8, 256, %s7_s11, [#allocation0] }
   0x3   :  { %37 = dma.done.wait [#allocation0], 256  }
   0x4   :  { %38 = vsyncadd [#allocation0], 4294967040 }
   0x5   :  { %12 = vsyncpa [#allocation0], 1 }

// kernel: custom-call.2
= control target key start
LH: loop header
LB: loop body
LE: loop exit
PB: predicated region body
PF: predicated region fallthrough
CT: control target
= control target key end

     0   :  { %s111_s0 = inlined_call_operand.vmem [shape: f32[2,16,8], index: 0, kind: input, shape index: {}]   ;;  %s112_s1 = inlined_call_operand.vmem [shape: f32[2,16,8], index: 1, kind: input, shape index: {}]   ;;  %s113_s2 = inlined_call_operand.vmem [shape: c64[2,16,8], index: 2, kind: output, shape index: {}]  }
   0x1   :  { %v4_v0 = vld [vmem:[%s111_s0] sm:$0xff]  ;;  %v35_v1 = vld [vmem:[%s111_s0 + $0x8] sm:$0xff]  ;;  %v37_v2 = vld [vmem:[%s111_s0 + $0x10] sm:$0xff] }
   0x2   :  { %5 = vst [vmem:[%s113_s2] sm:$0xff] %v4_v0  ;;  %v39_v3 = vld [vmem:[%s111_s0 + $0x18] sm:$0xff]  ;;  %v18_v4 = vld [vmem:[%s112_s1] sm:$0xff]  ;;  %v42_v5 = vld [vmem:[%s112_s1 + $0x8] sm:$0xff] }
   0x3   :  { %36 = vst [vmem:[%s113_s2 + $0x8] sm:$0xff] %v35_v1  ;;  %v44_v6 = vld [vmem:[%s112_s1 + $0x10] sm:$0xff]  ;;  %v46_v7 = vld [vmem:[%s112_s1 + $0x18] sm:$0xff] }
   0x4   :  { %38 = vst [vmem:[%s113_s2 + $0x10] sm:$0xff] %v37_v2 }
   0x5   :  { %40 = vst [vmem:[%s113_s2 + $0x18] sm:$0xff] %v39_v3 }
   0x6   :  { %41 = vst [vmem:[%s113_s2 + $0x20] sm:$0xff] %v18_v4 }
   0x7   :  { %43 = vst [vmem:[%s113_s2 + $0x28] sm:$0xff] %v42_v5 }
   0x8   :  { %45 = vst [vmem:[%s113_s2 + $0x30] sm:$0xff] %v44_v6 }
   0x9   :  { %47 = vst [vmem:[%s113_s2 + $0x38] sm:$0xff] %v46_v7 }

// kernel: _lambda_.2
= control target key start
LH: loop header
LB: loop body
LE: loop exit
PB: predicated region body
PF: predicated region fallthrough
CT: control target
= control target key end

     0   :  { %12 = vsyncpa [#allocation3], 0  ;;  %s192_s24 = smov [#allocation2]   ;;  %s193_s26 = smov 128   ;;  %s341_s0 = inlined_call_operand.vmem [shape: f32[8,128], index: 0, kind: input, shape index: {}]   ;;  %s342_s1 = inlined_call_operand.vmem [shape: f32[8,128], index: 1, kind: input, shape index: {}]   ;;  %s343_s2 = inlined_call_operand.vmem [shape: f32[128,128], index: 2, kind: input, shape index: {}]   ;;  %s344_s3 = inlined_call_operand.vmem [shape: f32[128,128], index: 3, kind: input, shape index: {}]   ;;  %s345_s4 = inlined_call_operand.hbm [shape: f32[128,128], index: 4, kind: input, shape index: {}]   ;;  %s346_s5 = inlined_call_operand.vmem [shape: f32[8,128], index: 5, kind: output, shape index: {0}]   ;;  %s347_s6 = inlined_call_operand.vmem [shape: f32[8,128], index: 6, kind: output, shape index: {1}]  }
   0x1   :  { %s25_s23 = sshll.u32 %s345_s4, 4  ;;  %s27_s25 = sshll.u32 %s192_s24, 4  ;;  %s26_s23 = int_to_ptr.hbm [resolvable:$true] %s25_s23  ;;  %s28_s25 = int_to_ptr.vmem [resolvable:$true] %s27_s25 }
   0x2   :  { %s194_s27 = smov 8  }
   0x3   :  { %33 = dma.hbm_to_vmem [thread:$0]  %s26_s23, 2048, %s28_s25, [#allocation3], %s193_s26, %s193_s26, %s194_s27  }
   0x4   :  { %190 = dma.done.wait [#allocation3], 2048  }
   0x5   :  { %191 = vsyncadd [#allocation3], 4294965248  ;;  %v128_v0 = vld [vmem:[#allocation2 + $0x78] sm:$0xff]  ;;  %v127_v1 = vld [vmem:[#allocation2 + $0x70] sm:$0xff] }
   0x6   :  { %129 = vmatpush.msra.mxu2 %v128_v0  ;;  %v55_v2 = vld [vmem:[%s343_s2 + $0x78] sm:$0xff]  ;;  %v126_v4 = vld [vmem:[#allocation2 + $0x68] sm:$0xff]  ;;  %v54_v5 = vld [vmem:[%s343_s2 + $0x70] sm:$0xff] }
   0x7   :  { %v91_v3 = vld [vmem:[%s344_s3 + $0x78] sm:$0xff]  ;;  %56 = vmatpush.msra.mxu0 %v55_v2  ;;  %v90_v6 = vld [vmem:[%s344_s3 + $0x70] sm:$0xff]  ;;  %v53_v7 = vld [vmem:[%s343_s2 + $0x68] sm:$0xff] }
   0x8   :  { %92 = vmatpush.msra.mxu1 %v91_v3  ;;  %130 = vmatpush.msra.mxu2 %v127_v1  ;;  %v89_v8 = vld [vmem:[%s344_s3 + $0x68] sm:$0xff]  ;;  %v125_v9 = vld [vmem:[#allocation2 + $0x60] sm:$0xff]  ;;  %v124_v12 = vld [vmem:[#allocation2 + $0x58] sm:$0xff] }
   0x9   :  { %57 = vmatpush.msra.mxu0 %v54_v5  ;;  %v52_v10 = vld [vmem:[%s343_s2 + $0x60] sm:$0xff]  ;;  %v51_v13 = vld [vmem:[%s343_s2 + $0x58] sm:$0xff]  ;;  %v123_v15 = vld [vmem:[#allocation2 + $0x50] sm:$0xff] }
   0xa   :  { %93 = vmatpush.msra.mxu1 %v90_v6  ;;  %131 = vmatpush.msra.mxu2 %v126_v4  ;;  %v88_v11 = vld [vmem:[%s344_s3 + $0x60] sm:$0xff]  ;;  %v87_v14 = vld [vmem:[%s344_s3 + $0x58] sm:$0xff]  ;;  %v50_v16 = vld [vmem:[%s343_s2 + $0x50] sm:$0xff] }
   0xb   :  { %58 = vmatpush.msra.mxu0 %v53_v7  ;;  %v86_v17 = vld [vmem:[%s344_s3 + $0x50] sm:$0xff]  ;;  %v122_v18 = vld [vmem:[#allocation2 + $0x48] sm:$0xff]  ;;  %v121_v21 = vld [vmem:[#allocation2 + $0x40] sm:$0xff] }
   0xc   :  { %94 = vmatpush.msra.mxu1 %v89_v8  ;;  %132 = vmatpush.msra.mxu2 %v125_v9  ;;  %v49_v19 = vld [vmem:[%s343_s2 + $0x48] sm:$0xff]  ;;  %v48_v22 = vld [vmem:[%s343_s2 + $0x40] sm:$0xff]  ;;  %v120_v24 = vld [vmem:[#allocation2 + $0x38] sm:$0xff] }
   0xd   :  { %59 = vmatpush.msra.mxu0 %v52_v10  ;;  %v85_v20 = vld [vmem:[%s344_s3 + $0x48] sm:$0xff]  ;;  %v84_v23 = vld [vmem:[%s344_s3 + $0x40] sm:$0xff]  ;;  %v47_v25 = vld [vmem:[%s343_s2 + $0x38] sm:$0xff] }
   0xe   :  { %95 = vmatpush.msra.mxu1 %v88_v11  ;;  %133 = vmatpush.msra.mxu2 %v124_v12  ;;  %v83_v26 = vld [vmem:[%s344_s3 + $0x38] sm:$0xff]  ;;  %v119_v27 = vld [vmem:[#allocation2 + $0x30] sm:$0xff]  ;;  %v118_v30 = vld [vmem:[#allocation2 + $0x28] sm:$0xff] }
   0xf   :  { %60 = vmatpush.msra.mxu0 %v51_v13  ;;  %v46_v28 = vld [vmem:[%s343_s2 + $0x30] sm:$0xff]  ;;  %v45_v31 = vld [vmem:[%s343_s2 + $0x28] sm:$0xff]  ;;  %v117_v33 = vld [vmem:[#allocation2 + $0x20] sm:$0xff] }
  0x10   :  { %96 = vmatpush.msra.mxu1 %v87_v14  ;;  %134 = vmatpush.msra.mxu2 %v123_v15  ;;  %v82_v29 = vld [vmem:[%s344_s3 + $0x30] sm:$0xff]  ;;  %v81_v32 = vld [vmem:[%s344_s3 + $0x28] sm:$0xff]  ;;  %v44_v34 = vld [vmem:[%s343_s2 + $0x20] sm:$0xff] }
  0x11   :  { %61 = vmatpush.msra.mxu0 %v50_v16  ;;  %v80_v35 = vld [vmem:[%s344_s3 + $0x20] sm:$0xff]  ;;  %v116_v36 = vld [vmem:[#allocation2 + $0x18] sm:$0xff]  ;;  %v115_v39 = vld [vmem:[#allocation2 + $0x10] sm:$0xff] }
  0x12   :  { %97 = vmatpush.msra.mxu1 %v86_v17  ;;  %135 = vmatpush.msra.mxu2 %v122_v18  ;;  %v43_v37 = vld [vmem:[%s343_s2 + $0x18] sm:$0xff]  ;;  %v38_v40 = vld [vmem:[%s341_s0] sm:$0xff]  ;;  %v42_v42 = vld [vmem:[%s343_s2 + $0x10] sm:$0xff] }
  0x13   :  { %62 = vmatpush.msra.mxu0 %v49_v19  ;;  %v79_v38 = vld [vmem:[%s344_s3 + $0x18] sm:$0xff]  ;;  %v39_v41 = vld [vmem:[%s342_s1] sm:$0xff]  ;;  %v78_v43 = vld [vmem:[%s344_s3 + $0x10] sm:$0xff] }
  0x14   :  { %98 = vmatpush.msra.mxu1 %v85_v20  ;;  %136 = vmatpush.msra.mxu2 %v121_v21  ;;  %v114_v44 = vld [vmem:[#allocation2 + $0x8] sm:$0xff]  ;;  %v113_v47 = vld [vmem:[#allocation2] sm:$0xff]  ;;  %v112_v48 = vadd.f32 %v39_v41, %v38_v40 }
  0x15   :  { %63 = vmatpush.msra.mxu0 %v48_v22  ;;  %v41_v45 = vld [vmem:[%s343_s2 + $0x8] sm:$0xff]  ;;  %v40_v49 = vld [vmem:[%s343_s2] sm:$0xff] }
  0x16   :  { %99 = vmatpush.msra.mxu1 %v84_v23  ;;  %137 = vmatpush.msra.mxu2 %v120_v24  ;;  %v77_v46 = vld [vmem:[%s344_s3 + $0x8] sm:$0xff]  ;;  %v76_v50 = vld [vmem:[%s344_s3] sm:$0xff] }
  0x17   :  { %64 = vmatpush.msra.mxu0 %v47_v25 }
  0x18   :  { %100 = vmatpush.msra.mxu1 %v83_v26  ;;  %138 = vmatpush.msra.mxu2 %v119_v27 }
  0x19   :  { %65 = vmatpush.msra.mxu0 %v46_v28 }
  0x1a   :  { %101 = vmatpush.msra.mxu1 %v82_v29  ;;  %139 = vmatpush.msra.mxu2 %v118_v30 }
  0x1b   :  { %66 = vmatpush.msra.mxu0 %v45_v31 }
  0x1c   :  { %102 = vmatpush.msra.mxu1 %v81_v32  ;;  %140 = vmatpush.msra.mxu2 %v117_v33 }
  0x1d   :  { %67 = vmatpush.msra.mxu0 %v44_v34 }
  0x1e   :  { %103 = vmatpush.msra.mxu1 %v80_v35  ;;  %141 = vmatpush.msra.mxu2 %v116_v36 }
  0x1f   :  { %68 = vmatpush.msra.mxu0 %v43_v37 }
  0x20   :  { %104 = vmatpush.msra.mxu1 %v79_v38  ;;  %142 = vmatpush.msra.mxu2 %v115_v39 }
  0x21   :  { %69 = vmatpush.msra.mxu0 %v42_v42 }
  0x22   :  { %105 = vmatpush.msra.mxu1 %v78_v43  ;;  %143 = vmatpush.msra.mxu2 %v114_v44 }
  0x23   :  { %70 = vmatpush.msra.mxu0 %v41_v45 }
  0x24   :  { %106 = vmatpush.msra.mxu1 %v77_v46  ;;  %144 = vmatpush.msra.mxu2 %v113_v47 }
  0x25   :  { %145 = vmatmul.f32.vlgmr.msra.gmra.mxu2 %v112_v48  ;;  %71 = vmatpush.msra.mxu0 %v40_v49 }
  0x26   :  { %107 = vmatpush.msra.mxu1 %v76_v50  ;;  %72 = vmatmul.f32.vlgmr.msra.gmra.mxu0 %v38_v40 }
  0x27   :  { %108 = vmatmul.f32.vlgmr.msra.gmra.mxu1 %v39_v41 }
  0xa3   :  { %v73_v51 = vpop.f32.mrf.mxu0 }
  0xa4   :  { %v109_v52 = vpop.f32.mrf.mxu1 }
  0xa5   :  { %v149_v53 = vsub.f32 %v73_v51, %v109_v52 }
  0xa7   :  { %150 = vst [vmem:[%s346_s5] sm:$0xff] %v149_v53 }
  0xa8   :  { %v146_v54 = vpop.f32.mrf.mxu2 }
  0xa9   :  { %v151_v55 = vsub.f32 %v146_v54, %v73_v51 }
  0xab   :  { %v152_v56 = vsub.f32 %v151_v55, %v109_v52 }
  0xad   :  { %153 = vst [vmem:[%s347_s6] sm:$0xff] %v152_v56 }
  0xae   :  { %162 = vsyncpa [#allocation3], 1 }

// kernel: _lambda_.3
= control target key start
LH: loop header
LB: loop body
LE: loop exit
PB: predicated region body
PF: predicated region fallthrough
CT: control target
= control target key end

     0   :  { %s337_s4 = inlined_call_operand.vmem [shape: f32[128,128], index: 4, kind: input, shape index: {}]   ;;  %s338_s2 = inlined_call_operand.vmem [shape: f32[128,128], index: 2, kind: input, shape index: {}]   ;;  %s339_s3 = inlined_call_operand.vmem [shape: f32[128,128], index: 3, kind: input, shape index: {}]   ;;  %s340_s0 = inlined_call_operand.vmem [shape: f32[8,128], index: 0, kind: input, shape index: {}]   ;;  %s341_s1 = inlined_call_operand.vmem [shape: f32[8,128], index: 1, kind: input, shape index: {}]   ;;  %s342_s5 = inlined_call_operand.vmem [shape: f32[8,128], index: 5, kind: output, shape index: {0}]   ;;  %s343_s6 = inlined_call_operand.vmem [shape: f32[8,128], index: 6, kind: output, shape index: {1}]  }
   0x1   :  { %v112_v0 = vld [vmem:[%s337_s4 + $0x78] sm:$0xff]  ;;  %v111_v1 = vld [vmem:[%s337_s4 + $0x70] sm:$0xff]  ;;  %v110_v4 = vld [vmem:[%s337_s4 + $0x68] sm:$0xff] }
   0x2   :  { %113 = vmatpush.msra.mxu2 %v112_v0  ;;  %v39_v2 = vld [vmem:[%s338_s2 + $0x78] sm:$0xff]  ;;  %v38_v5 = vld [vmem:[%s338_s2 + $0x70] sm:$0xff]  ;;  %v37_v7 = vld [vmem:[%s338_s2 + $0x68] sm:$0xff] }
   0x3   :  { %v75_v3 = vld [vmem:[%s339_s3 + $0x78] sm:$0xff]  ;;  %40 = vmatpush.msra.mxu0 %v39_v2  ;;  %v74_v6 = vld [vmem:[%s339_s3 + $0x70] sm:$0xff]  ;;  %v73_v8 = vld [vmem:[%s339_s3 + $0x68] sm:$0xff] }
   0x4   :  { %76 = vmatpush.msra.mxu1 %v75_v3  ;;  %114 = vmatpush.msra.mxu2 %v111_v1  ;;  %v109_v9 = vld [vmem:[%s337_s4 + $0x60] sm:$0xff]  ;;  %v108_v12 = vld [vmem:[%s337_s4 + $0x58] sm:$0xff]  ;;  %v107_v15 = vld [vmem:[%s337_s4 + $0x50] sm:$0xff] }
   0x5   :  { %41 = vmatpush.msra.mxu0 %v38_v5  ;;  %v36_v10 = vld [vmem:[%s338_s2 + $0x60] sm:$0xff]  ;;  %v35_v13 = vld [vmem:[%s338_s2 + $0x58] sm:$0xff]  ;;  %v34_v16 = vld [vmem:[%s338_s2 + $0x50] sm:$0xff] }
   0x6   :  { %77 = vmatpush.msra.mxu1 %v74_v6  ;;  %115 = vmatpush.msra.mxu2 %v110_v4  ;;  %v72_v11 = vld [vmem:[%s339_s3 + $0x60] sm:$0xff]  ;;  %v71_v14 = vld [vmem:[%s339_s3 + $0x58] sm:$0xff]  ;;  %v70_v17 = vld [vmem:[%s339_s3 + $0x50] sm:$0xff] }
   0x7   :  { %42 = vmatpush.msra.mxu0 %v37_v7  ;;  %v106_v18 = vld [vmem:[%s337_s4 + $0x48] sm:$0xff]  ;;  %v105_v21 = vld [vmem:[%s337_s4 + $0x40] sm:$0xff]  ;;  %v104_v24 = vld [vmem:[%s337_s4 + $0x38] sm:$0xff] }
   0x8   :  { %78 = vmatpush.msra.mxu1 %v73_v8  ;;  %116 = vmatpush.msra.mxu2 %v109_v9  ;;  %v33_v19 = vld [vmem:[%s338_s2 + $0x48] sm:$0xff]  ;;  %v32_v22 = vld [vmem:[%s338_s2 + $0x40] sm:$0xff]  ;;  %v31_v25 = vld [vmem:[%s338_s2 + $0x38] sm:$0xff] }
   0x9   :  { %43 = vmatpush.msra.mxu0 %v36_v10  ;;  %v69_v20 = vld [vmem:[%s339_s3 + $0x48] sm:$0xff]  ;;  %v68_v23 = vld [vmem:[%s339_s3 + $0x40] sm:$0xff]  ;;  %v67_v26 = vld [vmem:[%s339_s3 + $0x38] sm:$0xff] }
   0xa   :  { %79 = vmatpush.msra.mxu1 %v72_v11  ;;  %117 = vmatpush.msra.mxu2 %v108_v12  ;;  %v103_v27 = vld [vmem:[%s337_s4 + $0x30] sm:$0xff]  ;;  %v102_v30 = vld [vmem:[%s337_s4 + $0x28] sm:$0xff]  ;;  %v101_v33 = vld [vmem:[%s337_s4 + $0x20] sm:$0xff] }
   0xb   :  { %44 = vmatpush.msra.mxu0 %v35_v13  ;;  %v30_v28 = vld [vmem:[%s338_s2 + $0x30] sm:$0xff]  ;;  %v29_v31 = vld [vmem:[%s338_s2 + $0x28] sm:$0xff]  ;;  %v28_v34 = vld [vmem:[%s338_s2 + $0x20] sm:$0xff] }
   0xc   :  { %80 = vmatpush.msra.mxu1 %v71_v14  ;;  %118 = vmatpush.msra.mxu2 %v107_v15  ;;  %v66_v29 = vld [vmem:[%s339_s3 + $0x30] sm:$0xff]  ;;  %v65_v32 = vld [vmem:[%s339_s3 + $0x28] sm:$0xff]  ;;  %v64_v35 = vld [vmem:[%s339_s3 + $0x20] sm:$0xff] }
   0xd   :  { %45 = vmatpush.msra.mxu0 %v34_v16  ;;  %v100_v36 = vld [vmem:[%s337_s4 + $0x18] sm:$0xff]  ;;  %v99_v39 = vld [vmem:[%s337_s4 + $0x10] sm:$0xff]  ;;  %v22_v40 = vld [vmem:[%s340_s0] sm:$0xff] }
   0xe   :  { %81 = vmatpush.msra.mxu1 %v70_v17  ;;  %119 = vmatpush.msra.mxu2 %v106_v18  ;;  %v27_v37 = vld [vmem:[%s338_s2 + $0x18] sm:$0xff]  ;;  %v23_v41 = vld [vmem:[%s341_s1] sm:$0xff]  ;;  %v26_v42 = vld [vmem:[%s338_s2 + $0x10] sm:$0xff] }
   0xf   :  { %46 = vmatpush.msra.mxu0 %v33_v19  ;;  %v63_v38 = vld [vmem:[%s339_s3 + $0x18] sm:$0xff]  ;;  %v62_v43 = vld [vmem:[%s339_s3 + $0x10] sm:$0xff]  ;;  %v98_v44 = vld [vmem:[%s337_s4 + $0x8] sm:$0xff]  ;;  %v96_v48 = vadd.f32 %v23_v41, %v22_v40 }
  0x10   :  { %82 = vmatpush.msra.mxu1 %v69_v20  ;;  %120 = vmatpush.msra.mxu2 %v105_v21  ;;  %v25_v45 = vld [vmem:[%s338_s2 + $0x8] sm:$0xff]  ;;  %v97_v47 = vld [vmem:[%s337_s4] sm:$0xff] }
  0x11   :  { %47 = vmatpush.msra.mxu0 %v32_v22  ;;  %v61_v46 = vld [vmem:[%s339_s3 + $0x8] sm:$0xff]  ;;  %v24_v49 = vld [vmem:[%s338_s2] sm:$0xff] }
  0x12   :  { %83 = vmatpush.msra.mxu1 %v68_v23  ;;  %121 = vmatpush.msra.mxu2 %v104_v24  ;;  %v60_v50 = vld [vmem:[%s339_s3] sm:$0xff] }
  0x13   :  { %48 = vmatpush.msra.mxu0 %v31_v25 }
  0x14   :  { %84 = vmatpush.msra.mxu1 %v67_v26  ;;  %122 = vmatpush.msra.mxu2 %v103_v27 }
  0x15   :  { %49 = vmatpush.msra.mxu0 %v30_v28 }
  0x16   :  { %85 = vmatpush.msra.mxu1 %v66_v29  ;;  %123 = vmatpush.msra.mxu2 %v102_v30 }
  0x17   :  { %50 = vmatpush.msra.mxu0 %v29_v31 }
  0x18   :  { %86 = vmatpush.msra.mxu1 %v65_v32  ;;  %124 = vmatpush.msra.mxu2 %v101_v33 }
  0x19   :  { %51 = vmatpush.msra.mxu0 %v28_v34 }
  0x1a   :  { %87 = vmatpush.msra.mxu1 %v64_v35  ;;  %125 = vmatpush.msra.mxu2 %v100_v36 }
  0x1b   :  { %52 = vmatpush.msra.mxu0 %v27_v37 }
  0x1c   :  { %88 = vmatpush.msra.mxu1 %v63_v38  ;;  %126 = vmatpush.msra.mxu2 %v99_v39 }
  0x1d   :  { %53 = vmatpush.msra.mxu0 %v26_v42 }
  0x1e   :  { %89 = vmatpush.msra.mxu1 %v62_v43  ;;  %127 = vmatpush.msra.mxu2 %v98_v44 }
  0x1f   :  { %54 = vmatpush.msra.mxu0 %v25_v45 }
  0x20   :  { %90 = vmatpush.msra.mxu1 %v61_v46  ;;  %128 = vmatpush.msra.mxu2 %v97_v47 }
  0x21   :  { %129 = vmatmul.f32.vlgmr.msra.gmra.mxu2 %v96_v48  ;;  %55 = vmatpush.msra.mxu0 %v24_v49 }
  0x22   :  { %91 = vmatpush.msra.mxu1 %v60_v50  ;;  %56 = vmatmul.f32.vlgmr.msra.gmra.mxu0 %v22_v40 }
  0x23   :  { %92 = vmatmul.f32.vlgmr.msra.gmra.mxu1 %v23_v41 }
  0x9f   :  { %v57_v51 = vpop.f32.mrf.mxu0 }
  0xa0   :  { %v93_v52 = vpop.f32.mrf.mxu1 }
  0xa1   :  { %v133_v53 = vsub.f32 %v57_v51, %v93_v52 }
  0xa3   :  { %134 = vst [vmem:[%s342_s5] sm:$0xff] %v133_v53 }
  0xa4   :  { %v130_v54 = vpop.f32.mrf.mxu2 }
  0xa5   :  { %v135_v55 = vsub.f32 %v130_v54, %v57_v51 }
  0xa7   :  { %v136_v56 = vsub.f32 %v135_v55, %v93_v52 }
  0xa9   :  { %137 = vst [vmem:[%s343_s6] sm:$0xff] %v136_v56 }

</bundles_post_ra>
